<compile_context>
chip_gen: v5e
topology: v5e:2x2
jax: 0.10.0
libtpu: 0.0.40
codegen_flags: <defaults>
</compile_context>

<pallas_src>
import functools

import jax
import jax.numpy as jnp
from jax import lax
from jax.experimental import pallas as pl
from jax.experimental.pallas import tpu as pltpu

EMB = 200            # embedding size implied by .view(-1, 200)
HID = EMB // 2       # 100
NSEL = 5             # 5 attributes per example
VOCAB = 50           # synthetic vocab size (see TODO above)

EMB_PAD = 256        # lane-dense internal width
HID_PAD = 128        # lane-dense hidden width


def _choose_bm(batch):
    # Examples per grid step. Multiple of 8 so rows = 5*bm stays sublane aligned.
    # Cap at 256 (sweet spot once the S5 matmul is gone); for mid-size batches
    # pick ~ceil(batch/2) so grid_n >= 2 and both v7x TensorCores get a step
    # (dimension_semantics is a measured no-op on single-TC v5e/v6e).
    if batch <= 8:
        return 8
    half = -(-batch // 2)
    return min(256, ((half + 7) // 8) * 8)


def _attr_feature_kernel(idx_ref, table3_ref, w1t_ref, b1_ref, w2r_ref, b2_ref,
                         emb_out_ref, final_ref, *, bm, vocab_pad):
    f32 = jnp.float32
    rows = bm * NSEL                                     # attribute-major: row = k*bm + b

    # ---- fused exact embedding gather: "three-hot" bf16 selector, 1 MXU pass ----
    # table3 rows [j*vocab_pad + v, :] hold the j-th bf16 component of table[v, :]
    # (hi+mid+lo == f32 table row exactly); selector has a 1 at v, vp+v, 2vp+v.
    idx = idx_ref[...]                                                  # (rows, 1) i32
    col = lax.broadcasted_iota(jnp.int32, (rows, 3 * vocab_pad), 1)
    sel3 = (idx == (col & (vocab_pad - 1))).astype(jnp.bfloat16)        # (rows, 3*vp)
    emb = jnp.dot(sel3, table3_ref[...],
                  preferred_element_type=f32)                           # (rows, 256) exact f32

    # ---- Linear_1 + ReLU: single bf16 pass (feeds the 1e-3-tolerance attn path) ----
    h = jnp.dot(emb.astype(jnp.bfloat16), w1t_ref[...],
                preferred_element_type=f32)                             # (rows, 128)
    h = jnp.maximum(h + b1_ref[...], 0.0)

    # ---- Linear_2 (out dim 1): VPU multiply + lane reduce (no N=1 MXU matmul) ----
    logits = jnp.sum(h * w2r_ref[...], axis=1, keepdims=True) + b2_ref[...]  # (rows, 1)

    # ---- softmax over the 5 attributes: 5 aligned (bm,1) slabs, pure VPU/EUP ----
    lg = [logits[k * bm:(k + 1) * bm, :] for k in range(NSEL)]          # 5 x (bm, 1)
    m = lg[0]
    for k in range(1, NSEL):
        m = jnp.maximum(m, lg[k])
    e = [jnp.exp(v - m) for v in lg]
    s = e[0]
    for k in range(1, NSEL):
        s = s + e[k]
    inv = pl.reciprocal(s, approx=True)      # EUP seed ...
    inv = inv * (2.0 - s * inv)              # ... + one Newton step (fp32 accurate)

    # ---- weighted sum over the 5 attributes: 5 static-slice VPU FMAs ----
    final = None
    for k in range(NSEL):
        emb_k = emb[k * bm:(k + 1) * bm, :]                             # (bm, 256)
        emb_out_ref[k, :, :] = emb_k                                    # lane-dense store
        term = (e[k] * inv) * emb_k
        final = term if final is None else final + term
    final_ref[...] = final                                              # (bm, 256)


def extract_attribute_feature(indices, embedding_weight, w1, b1, w2, b2):
    """indices: (B, 5) int32.  Returns (finalState (B,200), embedded (B,5,200))."""
    batch = indices.shape[0]
    vocab, emb_dim = embedding_weight.shape
    assert emb_dim == EMB

    bm = _choose_bm(batch)
    b_pad = ((batch + bm - 1) // bm) * bm
    grid_n = b_pad // bm
    rows = NSEL * bm

    # indices: pad batch (dummy index 0), attribute-major within each bm-tile
    idx = indices.astype(jnp.int32)
    if b_pad != batch:
        idx = jnp.pad(idx, ((0, b_pad - batch), (0, 0)))
    idx_col = (idx.reshape(grid_n, bm, NSEL)
                  .transpose(0, 2, 1)                    # (grid, 5, bm)
                  .reshape(grid_n * rows, 1))

    # exact 3-way bf16 split of the f32 embedding table, stacked along K
    vocab_pad = max(8, 1 << (int(vocab) - 1).bit_length())   # power of 2 for & mask
    t = embedding_weight.astype(jnp.float32)
    hi = t.astype(jnp.bfloat16)
    r1 = t - hi.astype(jnp.float32)
    mid = r1.astype(jnp.bfloat16)
    lo = (r1 - mid.astype(jnp.float32)).astype(jnp.bfloat16)
    table3 = jnp.zeros((3 * vocab_pad, EMB_PAD), jnp.bfloat16)
    table3 = table3.at[0 * vocab_pad:0 * vocab_pad + vocab, :EMB].set(hi)
    table3 = table3.at[1 * vocab_pad:1 * vocab_pad + vocab, :EMB].set(mid)
    table3 = table3.at[2 * vocab_pad:2 * vocab_pad + vocab, :EMB].set(lo)

    # zero-padded, lane-dense parameters (W1 in bf16: single-pass MXU path)
    w1t_pad = jnp.zeros((EMB_PAD, HID_PAD), jnp.bfloat16).at[:EMB, :HID].set(
        w1.T.astype(jnp.bfloat16))
    b1_pad = jnp.zeros((1, HID_PAD), jnp.float32).at[0, :HID].set(b1.astype(jnp.float32))
    w2r_pad = jnp.zeros((1, HID_PAD), jnp.float32).at[0, :HID].set(
        w2.reshape(-1).astype(jnp.float32))
    b2_2d = b2.reshape(1, 1).astype(jnp.float32)

    kernel = functools.partial(_attr_feature_kernel, bm=bm, vocab_pad=vocab_pad)

    emb_out, final_out = pl.pallas_call(
        kernel,
        out_shape=(
            jax.ShapeDtypeStruct((NSEL, b_pad, EMB_PAD), jnp.float32),   # embedded (attr-major)
            jax.ShapeDtypeStruct((b_pad, EMB_PAD), jnp.float32),         # finalState
        ),
        grid_spec=pltpu.PrefetchScalarGridSpec(
            num_scalar_prefetch=0,
            grid=(grid_n,),
            in_specs=[
                pl.BlockSpec((rows, 1), lambda i: (i, 0)),               # indices (tiled)
                pl.BlockSpec((3 * vocab_pad, EMB_PAD), lambda i: (0, 0)),  # split table (resident)
                pl.BlockSpec((EMB_PAD, HID_PAD), lambda i: (0, 0)),      # W1^T bf16 (resident)
                pl.BlockSpec((1, HID_PAD), lambda i: (0, 0)),            # b1
                pl.BlockSpec((1, HID_PAD), lambda i: (0, 0)),            # w2 row
                pl.BlockSpec((1, 1), lambda i: (0, 0)),                  # b2
            ],
            out_specs=(
                pl.BlockSpec((NSEL, bm, EMB_PAD), lambda i: (0, i, 0)),  # embedded
                pl.BlockSpec((bm, EMB_PAD), lambda i: (i, 0)),           # finalState
            ),
        ),
        compiler_params=pltpu.CompilerParams(
            dimension_semantics=("parallel",),
            vmem_limit_bytes=32 * 1024 * 1024,
        ),
    )(idx_col, table3, w1t_pad, b1_pad, w2r_pad, b2_2d)

    # attribute-major (5, B, 256) -> batch-major (B, 5, 200); drop lane padding
    embedded = jnp.transpose(emb_out[:, :batch, :EMB], (1, 0, 2))
    final = final_out[:batch, :EMB]
    return final, embedded


def _reference(indices, embedding_weight, w1, b1, w2, b2):
    """Pure-JAX fp32-accurate reference matching the PyTorch forward."""
    batch = indices.shape[0]
    hp = lax.Precision.HIGHEST
    emb = jnp.take(embedding_weight, indices.reshape(-1), axis=0)        # (B*5, EMB)
    h = jnp.maximum(jnp.dot(emb, w1.T, precision=hp) + b1, 0.0)
    logits = (jnp.dot(h, w2.T, precision=hp) + b2).reshape(batch, NSEL)
    attn = jax.nn.softmax(logits, axis=1)
    final = jnp.einsum("bi,bid->bd", attn, emb.reshape(batch, NSEL, EMB), precision=hp)
    return final, emb.reshape(batch, NSEL, EMB)


if __name__ == "__main__":
    key = jax.random.PRNGKey(0)
    k_emb, k_w1, k_b1, k_w2, k_b2, k_idx = jax.random.split(key, 6)

    # Deterministic synthetic parameters (vector.txt not available — synthetic init)
    embedding_weight = jax.random.normal(k_emb, (VOCAB, EMB), jnp.float32) * 0.1
    w1 = jax.random.normal(k_w1, (HID, EMB), jnp.float32) * 0.05
    b1 = jax.random.normal(k_b1, (HID,), jnp.float32) * 0.05
    w2 = jax.random.normal(k_w2, (1, HID), jnp.float32) * 0.05
    b2 = jax.random.normal(k_b2, (1,), jnp.float32) * 0.05

    # Small example: batch=2, 5 attribute indices each
    indices = jax.random.randint(k_idx, (2, NSEL), 0, VOCAB, dtype=jnp.int32)

    final, embedded = extract_attribute_feature(indices, embedding_weight, w1, b1, w2, b2)
    final = jax.block_until_ready(final)
    embedded = jax.block_until_ready(embedded)

    ref_final, ref_emb = _reference(indices, embedding_weight, w1, b1, w2, b2)
    assert final.shape == (2, EMB) and embedded.shape == (2, NSEL, EMB)
    assert jnp.allclose(embedded, ref_emb, atol=1e-6, rtol=0.0), \
        float(jnp.max(jnp.abs(embedded - ref_emb)))
    assert jnp.allclose(final, ref_final, atol=1e-3, rtol=1e-3), \
        float(jnp.max(jnp.abs(final - ref_final)))

    # Second check: batch needing padding + multi-step grid (37 -> bm=24, grid=2)
    indices2 = jax.random.randint(jax.random.PRNGKey(1), (37, NSEL), 0, VOCAB,
                                  dtype=jnp.int32)
    final2, embedded2 = extract_attribute_feature(indices2, embedding_weight,
                                                  w1, b1, w2, b2)
    final2 = jax.block_until_ready(final2)
    ref_final2, ref_emb2 = _reference(indices2, embedding_weight, w1, b1, w2, b2)
    assert jnp.allclose(embedded2, ref_emb2, atol=1e-6, rtol=0.0), \
        float(jnp.max(jnp.abs(embedded2 - ref_emb2)))
    assert jnp.allclose(final2, ref_final2, atol=1e-3, rtol=1e-3), \
        float(jnp.max(jnp.abs(final2 - ref_final2)))

    print("KERNEL_OK")
</pallas_src>

<mosaic_0001>
module attributes {stable_mosaic.version = 11 : i64} {
  func.func @_attr_feature_kernel(%arg0: i32, %arg1: memref<40x1xi32, #tpu.memory_space<vmem>>, %arg2: memref<192x256xbf16, #tpu.memory_space<vmem>>, %arg3: memref<256x128xbf16, #tpu.memory_space<vmem>>, %arg4: memref<1x128xf32, #tpu.memory_space<vmem>>, %arg5: memref<1x128xf32, #tpu.memory_space<vmem>>, %arg6: memref<1x1xf32, #tpu.memory_space<vmem>>, %arg7: memref<5x8x256xf32, #tpu.memory_space<vmem>>, %arg8: memref<8x256xf32, #tpu.memory_space<vmem>>) attributes {dimension_semantics = [#tpu.dimension_semantics<parallel>], iteration_bounds = array<i64: 1>, scalar_prefetch = 0 : i64, scratch_operands = 0 : i64, tpu.core_type = #tpu.core_type<tc>, window_params = [{transform_indices = @transform_0, window_bounds = array<i64: 40, 1>}, {pipeline_mode = #tpu.pipeline_mode<synchronous>, transform_indices = @transform_1, window_bounds = array<i64: 192, 256>}, {pipeline_mode = #tpu.pipeline_mode<synchronous>, transform_indices = @transform_2, window_bounds = array<i64: 256, 128>}, {pipeline_mode = #tpu.pipeline_mode<synchronous>, transform_indices = @transform_3, window_bounds = array<i64: 1, 128>}, {pipeline_mode = #tpu.pipeline_mode<synchronous>, transform_indices = @transform_4, window_bounds = array<i64: 1, 128>}, {pipeline_mode = #tpu.pipeline_mode<synchronous>, transform_indices = @transform_5, window_bounds = array<i64: 1, 1>}, {transform_indices = @transform_6, window_bounds = array<i64: 5, 8, 256>}, {transform_indices = @transform_7, window_bounds = array<i64: 8, 256>}]} {
    %c0 = arith.constant 0 : index
    %c0_0 = arith.constant 0 : index
    %0 = vector.load %arg1[%c0, %c0_0] : memref<40x1xi32, #tpu.memory_space<vmem>>, vector<40x1xi32>
    %1 = tpu.iota {dimensions = array<i32: 1>} : vector<40x192xi32>
    %c63_i32 = arith.constant 63 : i32
    %2 = vector.broadcast %c63_i32 : i32 to vector<40x192xi32>
    %3 = arith.andi %1, %2 : vector<40x192xi32>
    %4 = vector.broadcast %0 : vector<40x1xi32> to vector<40x192xi32>
    %5 = arith.cmpi eq, %4, %3 : vector<40x192xi32>
    %6 = arith.extui %5 : vector<40x192xi1> to vector<40x192xi32>
    %7 = arith.sitofp %6 : vector<40x192xi32> to vector<40x192xf32>
    %8 = arith.truncf %7 : vector<40x192xf32> to vector<40x192xbf16>
    %c0_1 = arith.constant 0 : index
    %c0_2 = arith.constant 0 : index
    %9 = vector.load %arg2[%c0_1, %c0_2] : memref<192x256xbf16, #tpu.memory_space<vmem>>, vector<192x256xbf16>
    %cst = arith.constant dense<0.000000e+00> : vector<40x256xf32>
    %10 = tpu.matmul %8, %9, %cst {dimension_numbers = #tpu.dot_dimension_numbers<[1], [0], [0], [1], [0, 0, 1, 1], [], []>} : vector<40x192xbf16>, vector<192x256xbf16>, vector<40x256xf32> -> vector<40x256xf32>
    %11 = arith.truncf %10 : vector<40x256xf32> to vector<40x256xbf16>
    %c0_3 = arith.constant 0 : index
    %c0_4 = arith.constant 0 : index
    %12 = vector.load %arg3[%c0_3, %c0_4] : memref<256x128xbf16, #tpu.memory_space<vmem>>, vector<256x128xbf16>
    %cst_5 = arith.constant dense<0.000000e+00> : vector<40x128xf32>
    %13 = tpu.matmul %11, %12, %cst_5 {dimension_numbers = #tpu.dot_dimension_numbers<[1], [0], [0], [1], [0, 0, 1, 1], [], []>} : vector<40x256xbf16>, vector<256x128xbf16>, vector<40x128xf32> -> vector<40x128xf32>
    %c0_6 = arith.constant 0 : index
    %c0_7 = arith.constant 0 : index
    %14 = vector.load %arg4[%c0_6, %c0_7] : memref<1x128xf32, #tpu.memory_space<vmem>>, vector<1x128xf32>
    %15 = vector.broadcast %14 : vector<1x128xf32> to vector<40x128xf32>
    %16 = arith.addf %13, %15 : vector<40x128xf32>
    %cst_8 = arith.constant 0.000000e+00 : f32
    %17 = vector.broadcast %cst_8 : f32 to vector<40x128xf32>
    %18 = arith.maximumf %16, %17 : vector<40x128xf32>
    %c0_9 = arith.constant 0 : index
    %c0_10 = arith.constant 0 : index
    %19 = vector.load %arg5[%c0_9, %c0_10] : memref<1x128xf32, #tpu.memory_space<vmem>>, vector<1x128xf32>
    %20 = vector.broadcast %19 : vector<1x128xf32> to vector<40x128xf32>
    %21 = arith.mulf %18, %20 : vector<40x128xf32>
    %cst_11 = arith.constant dense<0.000000e+00> : vector<40xf32>
    %22 = vector.multi_reduction <add>, %21, %cst_11 [1] : vector<40x128xf32> to vector<40xf32>
    %23 = vector.shape_cast %22 : vector<40xf32> to vector<40x1xf32>
    %c0_12 = arith.constant 0 : index
    %c0_13 = arith.constant 0 : index
    %24 = vector.load %arg6[%c0_12, %c0_13] : memref<1x1xf32, #tpu.memory_space<vmem>>, vector<1x1xf32>
    %25 = vector.broadcast %24 : vector<1x1xf32> to vector<40x1xf32>
    %26 = arith.addf %23, %25 : vector<40x1xf32>
    %27 = vector.extract_strided_slice %26 {offsets = [0, 0], sizes = [8, 1], strides = [1, 1]} : vector<40x1xf32> to vector<8x1xf32>
    %28 = vector.extract_strided_slice %26 {offsets = [8, 0], sizes = [8, 1], strides = [1, 1]} : vector<40x1xf32> to vector<8x1xf32>
    %29 = vector.extract_strided_slice %26 {offsets = [16, 0], sizes = [8, 1], strides = [1, 1]} : vector<40x1xf32> to vector<8x1xf32>
    %30 = vector.extract_strided_slice %26 {offsets = [24, 0], sizes = [8, 1], strides = [1, 1]} : vector<40x1xf32> to vector<8x1xf32>
    %31 = vector.extract_strided_slice %26 {offsets = [32, 0], sizes = [8, 1], strides = [1, 1]} : vector<40x1xf32> to vector<8x1xf32>
    %32 = arith.maximumf %27, %28 : vector<8x1xf32>
    %33 = arith.maximumf %32, %29 : vector<8x1xf32>
    %34 = arith.maximumf %33, %30 : vector<8x1xf32>
    %35 = arith.maximumf %34, %31 : vector<8x1xf32>
    %36 = arith.subf %27, %35 : vector<8x1xf32>
    %37 = math.exp %36 : vector<8x1xf32>
    %38 = arith.subf %28, %35 : vector<8x1xf32>
    %39 = math.exp %38 : vector<8x1xf32>
    %40 = arith.subf %29, %35 : vector<8x1xf32>
    %41 = math.exp %40 : vector<8x1xf32>
    %42 = arith.subf %30, %35 : vector<8x1xf32>
    %43 = math.exp %42 : vector<8x1xf32>
    %44 = arith.subf %31, %35 : vector<8x1xf32>
    %45 = math.exp %44 : vector<8x1xf32>
    %46 = arith.addf %37, %39 : vector<8x1xf32>
    %47 = arith.addf %46, %41 : vector<8x1xf32>
    %48 = arith.addf %47, %43 : vector<8x1xf32>
    %49 = arith.addf %48, %45 : vector<8x1xf32>
    %50 = tpu.reciprocal %49 {approx = true} : vector<8x1xf32> -> vector<8x1xf32>
    %51 = arith.mulf %49, %50 : vector<8x1xf32>
    %cst_14 = arith.constant 2.000000e+00 : f32
    %52 = vector.broadcast %cst_14 : f32 to vector<8x1xf32>
    %53 = arith.subf %52, %51 : vector<8x1xf32>
    %54 = arith.mulf %50, %53 : vector<8x1xf32>
    %55 = vector.extract_strided_slice %10 {offsets = [0, 0], sizes = [8, 256], strides = [1, 1]} : vector<40x256xf32> to vector<8x256xf32>
    %c0_15 = arith.constant 0 : index
    %c0_16 = arith.constant 0 : index
    %c0_17 = arith.constant 0 : index
    %56 = vector.load %arg7[%c0_15, %c0_16, %c0_17] : memref<5x8x256xf32, #tpu.memory_space<vmem>>, vector<1x8x256xf32>
    %57 = vector.shape_cast %56 : vector<1x8x256xf32> to vector<8x256xf32>
    %58 = vector.shape_cast %55 : vector<8x256xf32> to vector<1x8x256xf32>
    tpu.vector_store %arg7[%c0_15, %c0_16, %c0_17], %58 {strides = array<i32>} : memref<5x8x256xf32, #tpu.memory_space<vmem>>, vector<1x8x256xf32>,
    %59 = arith.mulf %37, %54 : vector<8x1xf32>
    %60 = vector.broadcast %59 : vector<8x1xf32> to vector<8x256xf32>
    %61 = arith.mulf %60, %55 : vector<8x256xf32>
    %62 = vector.extract_strided_slice %10 {offsets = [8, 0], sizes = [8, 256], strides = [1, 1]} : vector<40x256xf32> to vector<8x256xf32>
    %c1 = arith.constant 1 : index
    %c0_18 = arith.constant 0 : index
    %c0_19 = arith.constant 0 : index
    %63 = vector.load %arg7[%c1, %c0_18, %c0_19] : memref<5x8x256xf32, #tpu.memory_space<vmem>>, vector<1x8x256xf32>
    %64 = vector.shape_cast %63 : vector<1x8x256xf32> to vector<8x256xf32>
    %65 = vector.shape_cast %62 : vector<8x256xf32> to vector<1x8x256xf32>
    tpu.vector_store %arg7[%c1, %c0_18, %c0_19], %65 {strides = array<i32>} : memref<5x8x256xf32, #tpu.memory_space<vmem>>, vector<1x8x256xf32>,
    %66 = arith.mulf %39, %54 : vector<8x1xf32>
    %67 = vector.broadcast %66 : vector<8x1xf32> to vector<8x256xf32>
    %68 = arith.mulf %67, %62 : vector<8x256xf32>
    %69 = arith.addf %61, %68 : vector<8x256xf32>
    %70 = vector.extract_strided_slice %10 {offsets = [16, 0], sizes = [8, 256], strides = [1, 1]} : vector<40x256xf32> to vector<8x256xf32>
    %c2 = arith.constant 2 : index
    %c0_20 = arith.constant 0 : index
    %c0_21 = arith.constant 0 : index
    %71 = vector.load %arg7[%c2, %c0_20, %c0_21] : memref<5x8x256xf32, #tpu.memory_space<vmem>>, vector<1x8x256xf32>
    %72 = vector.shape_cast %71 : vector<1x8x256xf32> to vector<8x256xf32>
    %73 = vector.shape_cast %70 : vector<8x256xf32> to vector<1x8x256xf32>
    tpu.vector_store %arg7[%c2, %c0_20, %c0_21], %73 {strides = array<i32>} : memref<5x8x256xf32, #tpu.memory_space<vmem>>, vector<1x8x256xf32>,
    %74 = arith.mulf %41, %54 : vector<8x1xf32>
    %75 = vector.broadcast %74 : vector<8x1xf32> to vector<8x256xf32>
    %76 = arith.mulf %75, %70 : vector<8x256xf32>
    %77 = arith.addf %69, %76 : vector<8x256xf32>
    %78 = vector.extract_strided_slice %10 {offsets = [24, 0], sizes = [8, 256], strides = [1, 1]} : vector<40x256xf32> to vector<8x256xf32>
    %c3 = arith.constant 3 : index
    %c0_22 = arith.constant 0 : index
    %c0_23 = arith.constant 0 : index
    %79 = vector.load %arg7[%c3, %c0_22, %c0_23] : memref<5x8x256xf32, #tpu.memory_space<vmem>>, vector<1x8x256xf32>
    %80 = vector.shape_cast %79 : vector<1x8x256xf32> to vector<8x256xf32>
    %81 = vector.shape_cast %78 : vector<8x256xf32> to vector<1x8x256xf32>
    tpu.vector_store %arg7[%c3, %c0_22, %c0_23], %81 {strides = array<i32>} : memref<5x8x256xf32, #tpu.memory_space<vmem>>, vector<1x8x256xf32>,
    %82 = arith.mulf %43, %54 : vector<8x1xf32>
    %83 = vector.broadcast %82 : vector<8x1xf32> to vector<8x256xf32>
    %84 = arith.mulf %83, %78 : vector<8x256xf32>
    %85 = arith.addf %77, %84 : vector<8x256xf32>
    %86 = vector.extract_strided_slice %10 {offsets = [32, 0], sizes = [8, 256], strides = [1, 1]} : vector<40x256xf32> to vector<8x256xf32>
    %c4 = arith.constant 4 : index
    %c0_24 = arith.constant 0 : index
    %c0_25 = arith.constant 0 : index
    %87 = vector.load %arg7[%c4, %c0_24, %c0_25] : memref<5x8x256xf32, #tpu.memory_space<vmem>>, vector<1x8x256xf32>
    %88 = vector.shape_cast %87 : vector<1x8x256xf32> to vector<8x256xf32>
    %89 = vector.shape_cast %86 : vector<8x256xf32> to vector<1x8x256xf32>
    tpu.vector_store %arg7[%c4, %c0_24, %c0_25], %89 {strides = array<i32>} : memref<5x8x256xf32, #tpu.memory_space<vmem>>, vector<1x8x256xf32>,
    %90 = arith.mulf %45, %54 : vector<8x1xf32>
    %91 = vector.broadcast %90 : vector<8x1xf32> to vector<8x256xf32>
    %92 = arith.mulf %91, %86 : vector<8x256xf32>
    %93 = arith.addf %85, %92 : vector<8x256xf32>
    %c0_26 = arith.constant 0 : index
    %c0_27 = arith.constant 0 : index
    %94 = vector.load %arg8[%c0_26, %c0_27] : memref<8x256xf32, #tpu.memory_space<vmem>>, vector<8x256xf32>
    tpu.vector_store %arg8[%c0_26, %c0_27], %93 {strides = array<i32>} : memref<8x256xf32, #tpu.memory_space<vmem>>, vector<8x256xf32>,
    return
  }
  func.func @transform_0(%arg0: i32) -> (i32, i32) {
    %c0_i32 = arith.constant 0 : i32
    %c0_i32_0 = arith.constant 0 : i32
    return %arg0, %c0_i32 : i32, i32
  }
  func.func @transform_1(%arg0: i32) -> (i32, i32) {
    %c0_i32 = arith.constant 0 : i32
    %c0_i32_0 = arith.constant 0 : i32
    %c0_i32_1 = arith.constant 0 : i32
    return %c0_i32, %c0_i32_0 : i32, i32
  }
  func.func @transform_2(%arg0: i32) -> (i32, i32) {
    %c0_i32 = arith.constant 0 : i32
    %c0_i32_0 = arith.constant 0 : i32
    %c0_i32_1 = arith.constant 0 : i32
    return %c0_i32, %c0_i32_0 : i32, i32
  }
  func.func @transform_3(%arg0: i32) -> (i32, i32) {
    %c0_i32 = arith.constant 0 : i32
    %c0_i32_0 = arith.constant 0 : i32
    %c0_i32_1 = arith.constant 0 : i32
    return %c0_i32, %c0_i32_0 : i32, i32
  }
  func.func @transform_4(%arg0: i32) -> (i32, i32) {
    %c0_i32 = arith.constant 0 : i32
    %c0_i32_0 = arith.constant 0 : i32
    %c0_i32_1 = arith.constant 0 : i32
    return %c0_i32, %c0_i32_0 : i32, i32
  }
  func.func @transform_5(%arg0: i32) -> (i32, i32) {
    %c0_i32 = arith.constant 0 : i32
    %c0_i32_0 = arith.constant 0 : i32
    %c0_i32_1 = arith.constant 0 : i32
    return %c0_i32, %c0_i32_0 : i32, i32
  }
  func.func @transform_6(%arg0: i32) -> (i32, i32, i32) {
    %c0_i32 = arith.constant 0 : i32
    %c0_i32_0 = arith.constant 0 : i32
    %c0_i32_1 = arith.constant 0 : i32
    return %c0_i32, %arg0, %c0_i32_0 : i32, i32, i32
  }
  func.func @transform_7(%arg0: i32) -> (i32, i32) {
    %c0_i32 = arith.constant 0 : i32
    %c0_i32_0 = arith.constant 0 : i32
    return %arg0, %c0_i32 : i32, i32
  }
}

</mosaic_0001>

<bundles_post_ra>
// kernel: tpu_custom_call.1
= control target key start
LH: loop header
LB: loop body
LE: loop exit
PB: predicated region body
PF: predicated region fallthrough
CT: control target
= control target key end

     0   :  { %s1242_s0 = inlined_call_operand.vmem [shape: s32[40,1], index: 0, kind: input, shape index: {}]   ;;  %s1243_s1 = inlined_call_operand.hbm [shape: bf16[192,256], index: 1, kind: input, shape index: {}]   ;;  %s1244_s2 = inlined_call_operand.hbm [shape: bf16[256,128], index: 2, kind: input, shape index: {}]   ;;  %s1245_s3 = inlined_call_operand.vmem [shape: f32[1,128], index: 3, kind: input, shape index: {}]   ;;  %s1246_s4 = inlined_call_operand.vmem [shape: f32[1,128], index: 4, kind: input, shape index: {}]   ;;  %s1247_s5 = inlined_call_operand.<no memory space> [shape: f32[1,1], index: 5, kind: input, shape index: {}]   ;;  %s1248_s6 = inlined_call_operand.hbm [shape: f32[5,8,256], index: 6, kind: output, shape index: {0}]   ;;  %s1249_s7 = inlined_call_operand.hbm [shape: f32[8,256], index: 7, kind: output, shape index: {1}]  }
   0x1   :  { %v13_v0 = vstv %s1247_s5 }
   0x2   :  { %14 = vst [vmem:[#allocation2] sm:$0x1] %v13_v0 }
   0x3   :  { %15 = vsyncpa [#allocation4], 0 }
   0x4   :  { %16 = vsyncpa [#allocation7], 0 }
   0x5   :  { %17 = vsyncpa [#allocation5], 0 }
   0x6   :  { %18 = vsyncpa [#allocation10], 0  ;;  %s25_s28 = sshll.u32 %s1243_s1, 4  ;;  %s1084_s29 = smov [#allocation3]   ;;  %s26_s28 = int_to_ptr.hbm [resolvable:$true] %s25_s28 }
   0x7   :  { %s27_s30 = sshll.u32 %s1084_s29, 4  ;;  %s38_s10 = sshll.u32 %s1244_s2, 4  ;;  %s28_s30 = int_to_ptr.vmem [resolvable:$true] %s27_s30  ;;  %s39_s10 = int_to_ptr.hbm [resolvable:$true] %s38_s10 }
   0x8   :  { %s1085_s11 = smov 128   ;;  %s1086_s12 = smov 8  }
   0x9   :  { %33 = dma.hbm_to_vmem [thread:$0]  %s26_s28, 3072, %s28_s30, [#allocation4], %s1085_s11, %s1085_s11, %s1086_s12  }
   0xa   :  { %s1087_s5 = smov [#allocation6]   ;;  %s1088_s14 = smov 64  }
   0xb   :  { %s40_s13 = sshll.u32 %s1087_s5, 4  ;;  %s1089_s15 = smov 4   ;;  %s41_s13 = int_to_ptr.vmem [resolvable:$true] %s40_s13 }
   0xc   :  { %46 = dma.hbm_to_vmem [thread:$0]  %s39_s10, 2048, %s41_s13, [#allocation7], %s1088_s14, %s1088_s14, %s1089_s15  }
   0xd   :  { %1076 = dma.done.wait [#allocation4], 3072  }
   0xe   :  { %1077 = vsyncadd [#allocation4], 4294964224 }
   0xf   :  { %1078 = dma.done.wait [#allocation7], 2048  }
  0x10   :  { %1079 = vsyncadd [#allocation7], 4294965248  ;;  %v1090_v1 = vmov 0   ;;  %v64_v2 = vld [vmem:[%s1242_s0 + $0x10] sm:$0xff]  ;;  %v62_v3 = vld [vmem:[%s1242_s0] sm:$0xff]  ;;  %vm267_vm5 = vcmask 523264  }
  0x11   :  { %963 = vset.pattern.permute.xlu1 %v1090_v1  ;;  %962 = vset.pattern.permute.xlu0 %v1090_v1  ;;  %v66_v4 = vld [vmem:[%s1242_s0 + $0x20] sm:$0xff]  ;;  %v781_v5 = vld [vmem:[#allocation3 + $0x70] sm:$0xf]  ;;  %v916_v6 = vld [vmem:[#allocation3 + $0x74] sm:$0xf0]  ;;  %s683_s29 = sshll.u32 %s1248_s6, 4  ;;  %s684_s29 = int_to_ptr.hbm [resolvable:$true] %s683_s29 }
  0x12   :  { %964 = vset.pattern.permute.xlu2 %v1090_v1  ;;  %79 = vperm.xlu1 %963, %v64_v2   ;;  %v915_v7 = vld [vmem:[#allocation3 + $0x74] sm:$0xf]  ;;  %v783_v8 = vld [vmem:[#allocation3 + $0x78] sm:$0xf0]  ;;  %v782_v9 = vor.u32 %v916_v6, %v781_v5  ;;  %v773_v11 = vld [vmem:[#allocation3 + $0x60] sm:$0xf] }
  0x13   :  { %73 = vperm.xlu0 %962, %v62_v3   ;;  %85 = vperm.xlu2 %964, %v66_v4   ;;  %v786_v10 = vor.u32 %v915_v7, %v783_v8  ;;  %v914_v12 = vld [vmem:[#allocation3 + $0x64] sm:$0xf0]  ;;  %v913_v13 = vld [vmem:[#allocation3 + $0x64] sm:$0xf]  ;;  %v775_v14 = vld [vmem:[#allocation3 + $0x68] sm:$0xf0] }
  0x14   :  { %277 = vmatpush.bf16.msra.mxu0 %v782_v9  ;;  %v65_v15 = vld [vmem:[%s1242_s0 + $0x18] sm:$0xff]  ;;  %v63_v16 = vld [vmem:[%s1242_s0 + $0x8] sm:$0xff]  ;;  %v774_v17 = vor.u32 %v914_v12, %v773_v11  ;;  %v778_v18 = vor.u32 %v913_v13, %v775_v14  ;;  %v765_v19 = vld [vmem:[#allocation3 + $0x50] sm:$0xf]  ;;  %s1094_s30 = smov 256   ;;  %s1095_s8 = smov 16  }
  0x15   :  { %323 = vmatpush.bf16.msra.mxu2 %v786_v10  ;;  %v912_v20 = vld [vmem:[#allocation3 + $0x54] sm:$0xf0]  ;;  %v911_v21 = vld [vmem:[#allocation3 + $0x54] sm:$0xf]  ;;  %v767_v22 = vld [vmem:[#allocation3 + $0x58] sm:$0xf0] }
  0x16   :  { %v813_v23 = vld [vmem:[#allocation3 + $0xb0] sm:$0xf]  ;;  %v924_v24 = vld [vmem:[#allocation3 + $0xb4] sm:$0xf0]  ;;  %v757_v25 = vld [vmem:[#allocation3 + $0x40] sm:$0xf]  ;;  %v766_v29 = vor.u32 %v912_v20, %v765_v19  ;;  %v770_v30 = vor.u32 %v911_v21, %v767_v22 }
  0x17   :  { %v1161_v26 = vor.u32 %v924_v24, %v813_v23  ;;  %v923_v27 = vld [vmem:[#allocation3 + $0xb4] sm:$0xf]  ;;  %v815_v28 = vld [vmem:[#allocation3 + $0xb8] sm:$0xf0]  ;;  %v910_v31 = vld [vmem:[#allocation3 + $0x44] sm:$0xf0] }
  0x18   :  { %278 = vmatpush.bf16.msra.mxu0 %v774_v17  ;;  %v909_v32 = vld [vmem:[#allocation3 + $0x44] sm:$0xf]  ;;  %v759_v33 = vld [vmem:[#allocation3 + $0x48] sm:$0xf0]  ;;  %v1163_v34 = vor.u32 %v923_v27, %v815_v28  ;;  %v758_v35 = vor.u32 %v910_v31, %v757_v25  ;;  %v749_v37 = vld [vmem:[#allocation3 + $0x30] sm:$0xf] }
  0x19   :  { %324 = vmatpush.bf16.msra.mxu2 %v778_v18  ;;  %941 = vmatpush.bf16.msra.mxu1 %v1161_v26  ;;  %v762_v36 = vor.u32 %v909_v32, %v759_v33  ;;  %v908_v38 = vld [vmem:[#allocation3 + $0x34] sm:$0xf0]  ;;  %v907_v39 = vld [vmem:[#allocation3 + $0x34] sm:$0xf]  ;;  %v751_v40 = vld [vmem:[#allocation3 + $0x38] sm:$0xf0] }
  0x1a   :  { %82 = vperm.xlu1 %963, %v65_v15   ;;  %945 = vmatpush.bf16.msra.mxu3 %v1163_v34  ;;  %v750_v41 = vor.u32 %v908_v38, %v749_v37  ;;  %v754_v42 = vor.u32 %v907_v39, %v751_v40  ;;  %v741_v43 = vld [vmem:[#allocation3 + $0x20] sm:$0xf]  ;;  %v906_v44 = vld [vmem:[#allocation3 + $0x24] sm:$0xf0]  ;;  %v905_v45 = vld [vmem:[#allocation3 + $0x24] sm:$0xf]  ;;  %v67_v15 = vlaneseq }
  0x1b   :  { %76 = vperm.xlu0 %962, %v63_v16   ;;  %v743_v46 = vld [vmem:[#allocation3 + $0x28] sm:$0xf0]  ;;  %v742_v47 = vor.u32 %v906_v44, %v741_v43  ;;  %v805_v49 = vld [vmem:[#allocation3 + $0xa0] sm:$0xf]  ;;  %v922_v50 = vld [vmem:[#allocation3 + $0xa4] sm:$0xf0] }
  0x1c   :  { %279 = vmatpush.bf16.msra.mxu0 %v766_v29  ;;  %v746_v48 = vor.u32 %v905_v45, %v743_v46  ;;  %v921_v51 = vld [vmem:[#allocation3 + $0xa4] sm:$0xf]  ;;  %v806_v52 = vor.u32 %v922_v50, %v805_v49  ;;  %v807_v53 = vld [vmem:[#allocation3 + $0xa8] sm:$0xf0]  ;;  %v733_v55 = vld [vmem:[#allocation3 + $0x10] sm:$0xf] }
  0x1d   :  { %325 = vmatpush.bf16.msra.mxu2 %v770_v30  ;;  %v810_v54 = vor.u32 %v921_v51, %v807_v53  ;;  %v904_v56 = vld [vmem:[#allocation3 + $0x14] sm:$0xf0]  ;;  %v903_v57 = vld [vmem:[#allocation3 + $0x14] sm:$0xf]  ;;  %v735_v59 = vld [vmem:[#allocation3 + $0x18] sm:$0xf0] }
  0x1e   :  { %942 = vmatpush.bf16.msra.mxu1 %v806_v52  ;;  %v734_v58 = vor.u32 %v904_v56, %v733_v55  ;;  %v797_v60 = vld [vmem:[#allocation3 + $0x90] sm:$0xf]  ;;  %v920_v61 = vld [vmem:[#allocation3 + $0x94] sm:$0xf0]  ;;  %v738_v62 = vor.u32 %v903_v57, %v735_v59  ;;  %v919_v0 = vld [vmem:[#allocation3 + $0x94] sm:$0xf] }
  0x1f   :  { %946 = vmatpush.bf16.msra.mxu3 %v810_v54  ;;  %v798_v63 = vor.u32 %v920_v61, %v797_v60  ;;  %v799_v1 = vld [vmem:[#allocation3 + $0x98] sm:$0xf0]  ;;  %v725_v2 = vld [vmem:[#allocation3] sm:$0xf]  ;;  %v902_v4 = vld [vmem:[#allocation3 + $0x4] sm:$0xf0] }
  0x20   :  { %280 = vmatpush.bf16.msra.mxu0 %v758_v35  ;;  %v802_v3 = vor.u32 %v919_v0, %v799_v1  ;;  %v901_v5 = vld [vmem:[#allocation3 + $0x4] sm:$0xf]  ;;  %v727_v6 = vld [vmem:[#allocation3 + $0x8] sm:$0xf0]  ;;  %v726_v7 = vor.u32 %v902_v4, %v725_v2  ;;  %v789_v9 = vld [vmem:[#allocation3 + $0x80] sm:$0xf] }
  0x21   :  { %326 = vmatpush.bf16.msra.mxu2 %v762_v36  ;;  %v730_v8 = vor.u32 %v901_v5, %v727_v6  ;;  %v918_v10 = vld [vmem:[#allocation3 + $0x84] sm:$0xf0]  ;;  %v917_v11 = vld [vmem:[#allocation3 + $0x84] sm:$0xf]  ;;  %v791_v13 = vld [vmem:[#allocation3 + $0x88] sm:$0xf0] }
  0x22   :  { %943 = vmatpush.bf16.msra.mxu1 %v798_v63  ;;  %v790_v12 = vor.u32 %v918_v10, %v789_v9  ;;  %v794_v14 = vor.u32 %v917_v11, %v791_v13  ;;  %v68_v16 = vand.u32 127, %v67_v15  ;;  %v1091_v22 = vmov 0.0   ;;  %v932_v35 = vld [vmem:[#allocation6 + $0x38] sm:$0xff]  ;;  %v931_v37 = vld [vmem:[#allocation6 + $0x30] sm:$0xff]  ;;  %v930_v40 = vld [vmem:[#allocation6 + $0x28] sm:$0xff]  ;;  %s1096_s6 = smov [#allocation9]  }
  0x23   :  { %947 = vmatpush.bf16.msra.mxu3 %v802_v3  ;;  %v1092_v28 = vmov 1.0|1.0   ;;  %v940_v39 = vld [vmem:[#allocation6 + $0x78] sm:$0xff]  ;;  %v929_v45 = vld [vmem:[#allocation6 + $0x20] sm:$0xff]  ;;  %v938_v46 = vld [vmem:[#allocation6 + $0x68] sm:$0xff]  ;;  %s695_s9 = sshll.u32 %s1096_s6, 4  ;;  %s696_s9 = int_to_ptr.vmem [resolvable:$true] %s695_s9 }
  0x24   :  { %281 = vmatpush.bf16.msra.mxu0 %v750_v41  ;;  %v69_v17 = vadd.s32 128, %v68_v16  ;;  %v70_v21 = vand.u32 63, %v68_v16  ;;  %v937_v50 = vld [vmem:[#allocation6 + $0x60] sm:$0xff]  ;;  %v927_v53 = vld [vmem:[#allocation6 + $0x10] sm:$0xff]  ;;  %v936_v56 = vld [vmem:[#allocation6 + $0x58] sm:$0xff]  ;;  %s697_s12 = sshll.u32 %s1249_s7, 4  ;;  %s698_s12 = int_to_ptr.hbm [resolvable:$true] %s697_s12 }
  0x25   :  { %327 = vmatpush.bf16.msra.mxu2 %v754_v42  ;;  %v939_v42 = vld [vmem:[#allocation6 + $0x70] sm:$0xff]  ;;  %v926_v57 = vld [vmem:[#allocation6 + $0x8] sm:$0xff]  ;;  %v933_v4 = vld [vmem:[#allocation6 + $0x40] sm:$0xff] }
  0x26   :  { %944 = vmatpush.bf16.msra.mxu1 %v790_v12  ;;  %v71_v20 = vand.u32 63, %v69_v17  ;;  %v935_v59 = vld [vmem:[#allocation6 + $0x50] sm:$0xff]  ;;  %v934_v2 = vld [vmem:[#allocation6 + $0x48] sm:$0xff] }
  0x27   :  { %948 = vmatpush.bf16.msra.mxu3 %v794_v14 }
  0x28   :  { %282 = vmatpush.bf16.msra.mxu0 %v742_v47 }
  0x29   :  { %328 = vmatpush.bf16.msra.mxu2 %v746_v48  ;;  %v928_v48 = vld [vmem:[#allocation6 + $0x18] sm:$0xff] }
  0x2a   :  { %507 = vmatpush.bf16.msrb.mxu1 %v932_v35 }
  0x2b   :  { %530 = vmatpush.bf16.msrb.mxu3 %v940_v39 }
  0x2c   :  { %283 = vmatpush.bf16.msra.mxu0 %v734_v58 }
  0x2d   :  { %329 = vmatpush.bf16.msra.mxu2 %v738_v62 }
  0x2e   :  { %508 = vmatpush.bf16.msrb.mxu1 %v931_v37 }
  0x2f   :  { %531 = vmatpush.bf16.msrb.mxu3 %v939_v42 }
  0x30   :  { %284 = vmatpush.bf16.msra.mxu0 %v726_v7 }
  0x31   :  { %330 = vmatpush.bf16.msra.mxu2 %v730_v8 }
  0x32   :  { %509 = vmatpush.bf16.msrb.mxu1 %v930_v40 }
  0x33   :  { %532 = vmatpush.bf16.msrb.mxu3 %v938_v46 }
  0x34   :  { %304 = vmatpush.bf16.msrb.mxu0 %v1161_v26 }
  0x35   :  { %350 = vmatpush.bf16.msrb.mxu2 %v1163_v34 }
  0x36   :  { %510 = vmatpush.bf16.msrb.mxu1 %v929_v45 }
  0x37   :  { %533 = vmatpush.bf16.msrb.mxu3 %v937_v50 }
  0x38   :  { %305 = vmatpush.bf16.msrb.mxu0 %v806_v52 }
  0x39   :  { %351 = vmatpush.bf16.msrb.mxu2 %v810_v54 }
  0x3a   :  { %511 = vmatpush.bf16.msrb.mxu1 %v928_v48 }
  0x3b   :  { %534 = vmatpush.bf16.msrb.mxu3 %v936_v56 }
  0x3c   :  { %306 = vmatpush.bf16.msrb.mxu0 %v798_v63  ;;  %v925_v63 = vld [vmem:[#allocation6] sm:$0xff] }
  0x3d   :  { %352 = vmatpush.bf16.msrb.mxu2 %v802_v3 }
  0x3e   :  { %512 = vmatpush.bf16.msrb.mxu1 %v927_v53 }
  0x3f   :  { %535 = vmatpush.bf16.msrb.mxu3 %v935_v59 }
  0x40   :  { %307 = vmatpush.bf16.msrb.mxu0 %v790_v12 }
  0x41   :  { %353 = vmatpush.bf16.msrb.mxu2 %v794_v14 }
  0x42   :  { %513 = vmatpush.bf16.msrb.mxu1 %v926_v57 }
  0x43   :  { %536 = vmatpush.bf16.msrb.mxu3 %v934_v2  ;;  %v967_v2 = vld [vmem:[#allocation2] ss:$0 sm:$0xff] }
  0x46   :  { %514 = vmatpush.bf16.msrb.mxu1 %v925_v63 }
  0x47   :  { %537 = vmatpush.bf16.msrb.mxu3 %v933_v4 }
  0x6d   :  { %v86_v29 = vpop.permute.xlu2 %85 }
  0x6e   :  { %vm96_vm6 = vcmp.eq.s32.totalorder %v86_v29, %v71_v20  ;;  %vm95_vm10 = vcmp.eq.s32.totalorder %v86_v29, %v70_v21 }
  0x6f   :  { %v722_v30 = vsel %vm96_vm6, 1.0, %v1091_v22  ;;  %vm823_vm11 = vmpackc.low %vm95_vm10, %vm95_vm10 }
  0x70   :  { %v122_v31 = vpack.c.bf16 %v722_v30, %v722_v30 }
  0x84   :  { %v80_v18 = vpop.permute.xlu1 %79 }
  0x85   :  { %v74_v19 = vpop.permute.xlu0 %73  ;;  %vm92_vm0 = vcmp.eq.s32.totalorder %v80_v18, %v71_v20  ;;  %vm91_vm7 = vcmp.eq.s32.totalorder %v80_v18, %v70_v21 }
  0x86   :  { %v718_v23 = vsel %vm92_vm0, 1.0, %v1091_v22  ;;  %vm87_vm1 = vcmp.eq.s32.totalorder %v74_v19, %v70_v21  ;;  %vm88_vm13 = vcmp.eq.s32.totalorder %v74_v19, %v71_v20 }
  0x87   :  { %v714_v33 = vsel %vm88_vm13, 1.0, %v1091_v22 }
  0x8c   :  { %v83_v24 = vpop.permute.xlu1 %82 }
  0x8d   :  { %v77_v25 = vpop.permute.xlu0 %76  ;;  %vm94_vm2 = vcmp.eq.s32.totalorder %v83_v24, %v71_v20  ;;  %vm93_vm8 = vcmp.eq.s32.totalorder %v83_v24, %v70_v21 }
  0x8e   :  { %vm89_vm3 = vcmp.eq.s32.totalorder %v77_v25, %v70_v21  ;;  %v720_v26 = vsel %vm94_vm2, 1.0, %v1091_v22  ;;  %vm821_vm9 = vmpackc.low %vm93_vm8, %vm91_vm7  ;;  %vm90_vm12 = vcmp.eq.s32.totalorder %v77_v25, %v71_v20 }
  0x8f   :  { %vm819_vm4 = vmpackc.low %vm89_vm3, %vm87_vm1  ;;  %v120_v27 = vpack.c.bf16 %v720_v26, %v718_v23  ;;  %v716_v32 = vsel %vm90_vm12, 1.0, %v1091_v22 }
  0x90   :  { %820 = vmatmul.msk.bf16.vlgmr.msra.gmra.mxu0 %vm819_vm4, %v1092_v28  ;;  %829 = vmatmul.msk.bf16.vlgmr.msra.gmra.mxu2 %vm819_vm4, %v1092_v28  ;;  %v118_v34 = vpack.c.bf16 %v716_v32, %v714_v33  ;;  %v966_v33 = vld [vmem:[%s1246_s4] ss:$0 sm:$0xff] }
  0x91   :  { %826 = vmatmul.msk.bf16.vlgmr.msra.gmra.mxu1 %vm267_vm5, %v120_v27  ;;  %835 = vmatmul.msk.bf16.vlgmr.msra.gmra.mxu3 %vm267_vm5, %v120_v27 }
  0xa0   :  { %822 = vmatmul.msk.bf16.gmra.mxu0 %vm821_vm9, %v1092_v28  ;;  %831 = vmatmul.msk.bf16.gmra.mxu2 %vm821_vm9, %v1092_v28 }
  0xa1   :  { %827 = vmatmul.msk.bf16.gmra.mxu1 %vm267_vm5, %v122_v31  ;;  %836 = vmatmul.msk.bf16.gmra.mxu3 %vm267_vm5, %v122_v31 }
  0xb0   :  { %824 = vmatmul.msk.bf16.gmra.mxu0 %vm823_vm11, %v1092_v28  ;;  %833 = vmatmul.msk.bf16.gmra.mxu2 %vm823_vm11, %v1092_v28  ;;  %v965_v28 = vld [vmem:[%s1245_s3] ss:$0 sm:$0xff]  ;;  %s1093_s3 = smov [#allocation8]  }
  0xb1   :  { %s681_s4 = sshll.u32 %s1093_s3, 4  ;;  %s682_s4 = int_to_ptr.vmem [resolvable:$true] %s681_s4 }
  0xc0   :  { %825 = vmatmul.msk.bf16.vlgmr.msrb.gmra.mxu0 %vm267_vm5, %v118_v34  ;;  %834 = vmatmul.msk.bf16.vlgmr.msrb.gmra.mxu2 %vm267_vm5, %v118_v34 }
 0x10d   :  { %v1175_v36 = vpop.f32.mrf.mxu0 }
 0x10e   :  { %v314_v38 = vpop.f32.mrf.mxu1 }
 0x113   :  { %v332_v41 = vpop.f32.mrf.mxu2 }
 0x114   :  { %v360_v44 = vpop.f32.mrf.mxu3 }
 0x115   :  { %v288_v43 = vpop.f32.mrf.mxu0 }
 0x116   :  { %v316_v47 = vpop.f32.mrf.mxu1 }
 0x11b   :  { %v334_v49 = vpop.f32.mrf.mxu2 }
 0x11c   :  { %v362_v52 = vpop.f32.mrf.mxu3 }
 0x11d   :  { %v291_v51 = vpop.f32.mrf.mxu0 }
 0x11e   :  { %v1177_v54 = vadd.f32 %v314_v38, %v291_v51  ;;  %v319_v55 = vpop.f32.mrf.mxu1 }
 0x120   :  { %637 = vst [vmem:[#allocation8 + $0x20] sm:$0xff] %v1177_v54 }
 0x123   :  { %v337_v58 = vpop.f32.mrf.mxu2 }
 0x124   :  { %v1180_v60 = vadd.f32 %v360_v44, %v337_v58  ;;  %v365_v62 = vpop.f32.mrf.mxu3 }
 0x125   :  { %v293_v61 = vpop.f32.mrf.mxu0 }
 0x126   :  { %638 = vst [vmem:[#allocation8 + $0x28] sm:$0xff] %v1180_v60  ;;  %v1183_v0 = vadd.f32 %v316_v47, %v293_v61  ;;  %v321_v1 = vpop.f32.mrf.mxu1 }
 0x128   :  { %650 = vst [vmem:[#allocation8 + $0x30] sm:$0xff] %v1183_v0  ;;  %v371_v23 = vpack.c.bf16 %v1183_v0, %v1177_v54 }
 0x12b   :  { %v339_v3 = vpop.f32.mrf.mxu2 }
 0x12c   :  { %v1186_v5 = vadd.f32 %v362_v52, %v339_v3  ;;  %v367_v7 = vpop.f32.mrf.mxu3 }
 0x12d   :  { %v296_v6 = vpop.f32.mrf.mxu0 }
 0x12e   :  { %651 = vst [vmem:[#allocation8 + $0x38] sm:$0xff] %v1186_v5  ;;  %v1189_v8 = vadd.f32 %v319_v55, %v296_v6  ;;  %v372_v24 = vpack.c.bf16 %v1186_v5, %v1180_v60 }
 0x130   :  { %663 = vst [vmem:[#allocation8 + $0x40] sm:$0xff] %v1189_v8  ;;  %v373_v25 = vpack.c.bf16 %v1189_v8, %v1189_v8 }
 0x133   :  { %v342_v9 = vpop.f32.mrf.mxu2 }
 0x134   :  { %v1192_v10 = vadd.f32 %v365_v62, %v342_v9 }
 0x135   :  { %v298_v11 = vpop.f32.mrf.mxu0 }
 0x136   :  { %664 = vst [vmem:[#allocation8 + $0x48] sm:$0xff] %v1192_v10  ;;  %v374_v26 = vpack.c.bf16 %v1192_v10, %v1192_v10 }
 0x13b   :  { %v344_v12 = vpop.f32.mrf.mxu2 }
 0x13d   :  { %v309_v13 = vpop.f32.mrf.mxu0 }
 0x13e   :  { %v1196_v14 = vadd.f32 %v309_v13, %v1175_v36 }
 0x140   :  { %613 = vst [vmem:[#allocation8] sm:$0xff] %v1196_v14 }
 0x143   :  { %v355_v15 = vpop.f32.mrf.mxu2 }
 0x144   :  { %v1199_v16 = vadd.f32 %v355_v15, %v332_v41 }
 0x145   :  { %v311_v17 = vpop.f32.mrf.mxu0 }
 0x146   :  { %614 = vst [vmem:[#allocation8 + $0x8] sm:$0xff] %v1199_v16  ;;  %v1202_v18 = vadd.f32 %v311_v17, %v288_v43 }
 0x148   :  { %624 = vst [vmem:[#allocation8 + $0x10] sm:$0xff] %v1202_v18  ;;  %v369_v19 = vpack.c.bf16 %v1202_v18, %v1196_v14 }
 0x14a   :  { %515 = vmatmul.bf16.vlgmr.msrb.gmra.mxu1 %v369_v19 }
 0x14b   :  { %v357_v20 = vpop.f32.mrf.mxu2 }
 0x14c   :  { %v1207_v21 = vadd.f32 %v357_v20, %v334_v49 }
 0x14e   :  { %625 = vst [vmem:[#allocation8 + $0x18] sm:$0xff] %v1207_v21  ;;  %v370_v22 = vpack.c.bf16 %v1207_v21, %v1199_v16 }
 0x14f   :  { %689 = dma.vmem_to_hbm [thread:$0]  %s682_s4, 1280, %s684_s29, [#allocation5], %s1094_s30, %s1094_s30, %s1095_s8  }
 0x150   :  { %538 = vmatmul.bf16.vlgmr.msrb.gmra.mxu3 %v370_v22 }
 0x15a   :  { %520 = vmatmul.bf16.gmra.mxu1 %v371_v23 }
 0x160   :  { %543 = vmatmul.bf16.gmra.mxu3 %v372_v24 }
 0x16a   :  { %525 = vmatmul.bf16.gmra.mxu1 %v373_v25 }
 0x170   :  { %548 = vmatmul.bf16.gmra.mxu3 %v374_v26 }
 0x1c7   :  { %v516_v27 = vpop.f32.mrf.mxu1 }
 0x1c8   :  { %v517_v30 = vadd.f32 %v965_v28, %v516_v27 }
 0x1cf   :  { %v518_v29 = vpop.f32.mrf.mxu1 }
 0x1d0   :  { %v519_v37 = vadd.f32 %v965_v28, %v518_v29 }
 0x1d3   :  { %v539_v31 = vpop.f32.mrf.mxu3 }
 0x1d4   :  { %v540_v32 = vadd.f32 %v539_v31, %v517_v30 }
 0x1d6   :  { %v553_v34 = vmax.f32 %v540_v32, 0.0 }
 0x1d7   :  { %v521_v35 = vpop.f32.mrf.mxu1 }
 0x1d8   :  { %v562_v36 = vmul.f32 %v966_v33, %v553_v34  ;;  %v522_v43 = vadd.f32 %v965_v28, %v521_v35 }
 0x1da   :  { %567 = vadd.xlane.f32.xlu2 %v562_v36 }
 0x1db   :  { %v541_v38 = vpop.f32.mrf.mxu3 }
 0x1dc   :  { %v542_v39 = vadd.f32 %v541_v38, %v519_v37 }
 0x1de   :  { %v554_v40 = vmax.f32 %v542_v39, 0.0 }
 0x1df   :  { %v523_v41 = vpop.f32.mrf.mxu1 }
 0x1e0   :  { %v563_v42 = vmul.f32 %v966_v33, %v554_v40  ;;  %v524_v49 = vadd.f32 %v965_v28, %v523_v41 }
 0x1e2   :  { %569 = vadd.xlane.f32.xlu0 %v563_v42 }
 0x1e3   :  { %v544_v44 = vpop.f32.mrf.mxu3 }
 0x1e4   :  { %v545_v45 = vadd.f32 %v544_v44, %v522_v43 }
 0x1e6   :  { %v555_v46 = vmax.f32 %v545_v45, 0.0 }
 0x1e7   :  { %v526_v47 = vpop.f32.mrf.mxu1 }
 0x1e8   :  { %v564_v48 = vmul.f32 %v966_v33, %v555_v46  ;;  %v527_v56 = vadd.f32 %v965_v28, %v526_v47 }
 0x1ea   :  { %571 = vadd.xlane.f32.xlu1 %v564_v48 }
 0x1eb   :  { %v546_v50 = vpop.f32.mrf.mxu3 }
 0x1ec   :  { %v547_v51 = vadd.f32 %v546_v50, %v524_v49 }
 0x1ee   :  { %v556_v52 = vmax.f32 %v547_v51, 0.0 }
 0x1ef   :  { %v528_v53 = vpop.f32.mrf.mxu1 }
 0x1f0   :  { %v565_v55 = vmul.f32 %v966_v33, %v556_v52 }
 0x1f2   :  { %573 = vadd.xlane.f32.xlu2 %v565_v55 }
 0x1f3   :  { %v549_v57 = vpop.f32.mrf.mxu3 }
 0x1f4   :  { %v550_v58 = vadd.f32 %v549_v57, %v527_v56 }
 0x1f6   :  { %v557_v59 = vmax.f32 %v550_v58, 0.0 }
 0x1f8   :  { %v566_v61 = vmul.f32 %v966_v33, %v557_v59 }
 0x1fa   :  { %575 = vadd.xlane.f32.xlu2 %v566_v61 }
 0x1fb   :  { %v551_v62 = vpop.f32.mrf.mxu3 }
 0x24d   :  { %v568_v63 = vpop.xlane.xlu2 %567 }
 0x24e   :  { %v581_v7 = vadd.f32 %v967_v2, %v568_v63 }
 0x255   :  { %v570_v1 = vpop.xlane.xlu0 %569 }
 0x256   :  { %v582_v6 = vadd.f32 %v967_v2, %v570_v1 }
 0x258   :  { %v586_v11 = vmax.f32 %v581_v7, %v582_v6 }
 0x25d   :  { %v572_v3 = vpop.xlane.xlu1 %571 }
 0x25e   :  { %v583_v9 = vadd.f32 %v967_v2, %v572_v3 }
 0x260   :  { %v587_v13 = vmax.f32 %v586_v11, %v583_v9 }
 0x265   :  { %v574_v4 = vpop.xlane.xlu2 %573 }
 0x266   :  { %v584_v12 = vadd.f32 %v967_v2, %v574_v4 }
 0x268   :  { %v588_v17 = vmax.f32 %v587_v13, %v584_v12 }
 0x26d   :  { %v576_v15 = vpop.xlane.xlu2 %575 }
 0x26e   :  { %v585_v19 = vadd.f32 %v967_v2, %v576_v15 }
 0x270   :  { %v589_v20 = vmax.f32 %v588_v17, %v585_v19 }
 0x272   :  { %v590_v22 = vsub.f32 %v581_v7, %v589_v20  ;;  %v593_v23 = vsub.f32 %v582_v6, %v589_v20  ;;  %v596_v24 = vsub.f32 %v583_v9, %v589_v20  ;;  %v599_v25 = vsub.f32 %v584_v12, %v589_v20 }
 0x273   :  { %v602_v29 = vsub.f32 %v585_v19, %v589_v20 }
 0x274   :  { %v591_v26 = vmul.f32 1.442695, %v590_v22  ;;  %v594_v27 = vmul.f32 1.442695, %v593_v23  ;;  %v597_v28 = vmul.f32 1.442695, %v596_v24 }
 0x275   :  { %v600_v30 = vmul.f32 1.442695, %v599_v25  ;;  %v603_v31 = vmul.f32 1.442695, %v602_v29 }
 0x276   :  { %968 = vpow2.f32 %v591_v26 }
 0x277   :  { %970 = vpow2.f32 %v594_v27 }
 0x278   :  { %972 = vpow2.f32 %v597_v28 }
 0x279   :  { %974 = vpow2.f32 %v600_v30 }
 0x27a   :  { %976 = vpow2.f32 %v603_v31 }
 0x27c   :  { %v969_v32 = vpop.eup %968 }
 0x27d   :  { %v971_v33 = vpop.eup %970 }
 0x27e   :  { %v605_v34 = vadd.f32 %v971_v33, %v969_v32  ;;  %v973_v35 = vpop.eup %972 }
 0x27f   :  { %v975_v37 = vpop.eup %974 }
 0x280   :  { %v606_v36 = vadd.f32 %v973_v35, %v605_v34  ;;  %v977_v39 = vpop.eup %976 }
 0x282   :  { %v607_v38 = vadd.f32 %v975_v37, %v606_v36 }
 0x284   :  { %v608_v40 = vadd.f32 %v977_v39, %v607_v38 }
 0x286   :  { %978 = vrcp.f32 %v608_v40 }
 0x28c   :  { %v979_v41 = vpop.eup %978 }
 0x28d   :  { %v610_v42 = vmul.f32 %v979_v41, %v608_v40 }
 0x28f   :  { %v611_v43 = vsub.f32 2.0, %v610_v42 }
 0x291   :  { %v612_v44 = vmul.f32 %v979_v41, %v611_v43 }
 0x293   :  { %v639_v45 = vmul.f32 %v973_v35, %v612_v44  ;;  %v626_v46 = vmul.f32 %v971_v33, %v612_v44  ;;  %v615_v47 = vmul.f32 %v969_v32, %v612_v44  ;;  %v665_v48 = vmul.f32 %v977_v39, %v612_v44 }
 0x294   :  { %v652_v49 = vmul.f32 %v975_v37, %v612_v44 }
 0x295   :  { %642 = vperm.xlu2 %964, %v639_v45   ;;  %629 = vperm.xlu1 %963, %v626_v46  }
 0x296   :  { %618 = vperm.xlu0 %962, %v615_v47  }
 0x29d   :  { %668 = vperm.xlu1 %963, %v665_v48  }
 0x29e   :  { %655 = vperm.xlu0 %962, %v652_v49  }
 0x2ef   :  { %v643_v57 = vpop.permute.xlu2 %642 }
 0x2f0   :  { %v645_v61 = vmul.f32 %v643_v57, %v1177_v54  ;;  %v646_v62 = vmul.f32 %v643_v57, %v1180_v60 }
 0x307   :  { %v630_v50 = vpop.permute.xlu1 %629 }
 0x308   :  { %v619_v51 = vpop.permute.xlu0 %618  ;;  %v632_v52 = vmul.f32 %v630_v50, %v1202_v18  ;;  %v633_v53 = vmul.f32 %v630_v50, %v1207_v21 }
 0x309   :  { %v621_v55 = vmul.f32 %v619_v51, %v1196_v14  ;;  %v622_v56 = vmul.f32 %v619_v51, %v1199_v16 }
 0x30b   :  { %v634_v58 = vadd.f32 %v632_v52, %v621_v55  ;;  %v635_v59 = vadd.f32 %v633_v53, %v622_v56 }
 0x30d   :  { %v647_v2 = vadd.f32 %v645_v61, %v634_v58  ;;  %v648_v3 = vadd.f32 %v646_v62, %v635_v59 }
 0x30f   :  { %v669_v63 = vpop.permute.xlu1 %668 }
 0x310   :  { %v656_v1 = vpop.permute.xlu0 %655  ;;  %v671_v21 = vmul.f32 %v669_v63, %v1189_v8  ;;  %v672_v14 = vmul.f32 %v669_v63, %v1192_v10 }
 0x311   :  { %v658_v4 = vmul.f32 %v656_v1, %v1183_v0  ;;  %v659_v18 = vmul.f32 %v656_v1, %v1186_v5 }
 0x313   :  { %v660_v16 = vadd.f32 %v658_v4, %v647_v2  ;;  %v661_v6 = vadd.f32 %v659_v18, %v648_v3 }
 0x315   :  { %v673_v54 = vadd.f32 %v671_v21, %v660_v16  ;;  %v674_v60 = vadd.f32 %v672_v14, %v661_v6 }
 0x317   :  { %675 = vst [vmem:[#allocation9] sm:$0xff] %v673_v54 }
 0x318   :  { %676 = vst [vmem:[#allocation9 + $0x8] sm:$0xff] %v674_v60 }
 0x319   :  { %700 = dma.vmem_to_hbm [thread:$0]  %s696_s9, 256, %s698_s12, [#allocation10]  }
 0x31a   :  { %1080 = dma.done.wait [#allocation5], 1280  }
 0x31b   :  { %1081 = vsyncadd [#allocation5], 4294966016 }
 0x31c   :  { %1082 = dma.done.wait [#allocation10], 256  }
 0x31d   :  { %1083 = vsyncadd [#allocation10], 4294967040 }
 0x31e   :  { %709 = vsyncpa [#allocation4], 1 }
 0x31f   :  { %710 = vsyncpa [#allocation7], 1 }
 0x320   :  { %711 = vsyncpa [#allocation5], 1 }
 0x321   :  { %712 = vsyncpa [#allocation10], 1 }

</bundles_post_ra>
